<compile_context>
chip_gen: v7x
topology: tpu7x:2x2x1
jax: 0.10.0
libtpu: 0.0.40
codegen_flags: <defaults>
</compile_context>

<pallas_src>
import functools

import jax
import jax.numpy as jnp
import numpy as np
from jax.experimental import pallas as pl
from jax.experimental.pallas import tpu as pltpu

# Abramowitz & Stegun 4.4.46: arccos(x) = sqrt(1-x) * poly(x), 0 <= x <= 1,
# |error| <= ~2e-8 (below f32 epsilon at these magnitudes).
_ACOS_COEFFS = (1.5707963050, -0.2145988016, 0.0889789874, -0.0501743046,
                0.0308918810, -0.0170881256, 0.0066700901, -0.0012624911)
_PI = 3.14159265358979323846


def _acos(x):
    """arccos for x in [-1, 1] using only VPU/EUP ops (mul/add/sqrt/select)."""
    y = jnp.abs(x)
    p = _ACOS_COEFFS[-1]
    for coef in _ACOS_COEFFS[-2::-1]:          # Horner
        p = p * y + coef
    r = jnp.sqrt(jnp.maximum(1.0 - y, 0.0)) * p
    return jnp.where(x >= 0.0, r, _PI - r)


def _bc_loss_kernel(out_ref, tgt_ref, aux_o_ref, aux_t_ref, logit_ref, gt_ref,
                    loss_ref, acc_ref, *,
                    b_total, n, a, c, tile_b,
                    lamb_l2, lamb_l1, lamb_c, lamb_g, lamb_aux):
    pid = pl.program_id(0)

    @pl.when(pid == 0)
    def _():
        acc_ref[0] = 0.0

    # Row-validity mask for the (possibly padded) last tile.
    row = pid * tile_b + jax.lax.broadcasted_iota(jnp.int32, (tile_b, 1), 0)
    valid = row < b_total                                          # [T,1] bool

    # Upcast after the DMA (supports bf16 inputs with half the HBM traffic).
    output = out_ref[...].astype(jnp.float32)                      # [T,N]
    target = tgt_ref[...].astype(jnp.float32)                      # [T,N]

    # ---- nn.MSELoss / nn.L1Loss: per-row lane partials ----------------------
    diff = output - target
    r_sq = jnp.sum(diff * diff, axis=1, keepdims=True)             # [T,1]
    r_abs = jnp.sum(jnp.abs(diff), axis=1, keepdims=True)          # [T,1]

    # ---- auxiliary MSE -------------------------------------------------------
    adiff = aux_o_ref[...].astype(jnp.float32) - aux_t_ref[...].astype(jnp.float32)
    r_aux = jnp.sum(adiff * adiff, axis=1, keepdims=True)          # [T,1]

    # ---- nn.CrossEntropyLoss (integer targets, in-kernel one-hot) -----------
    logits = logit_ref[...].astype(jnp.float32)                    # [T,C]
    m = jnp.max(logits, axis=1, keepdims=True)
    lse = jnp.log(jnp.sum(jnp.exp(logits - m), axis=1, keepdims=True)) + m
    cls = jax.lax.broadcasted_iota(jnp.int32, (tile_b, c), 1)
    picked = jnp.sum(jnp.where(cls == gt_ref[...], logits, 0.0),
                     axis=1, keepdims=True)
    r_g = lse - picked                                             # [T,1]

    # ---- cosine term: acos(<o,t> / (||o|| ||t||)) per row --------------------
    num = jnp.sum(output * target, axis=1, keepdims=True)          # [T,1]
    so = jnp.sum(output * output, axis=1, keepdims=True)           # [T,1]
    st = jnp.sum(target * target, axis=1, keepdims=True)           # [T,1]
    inv_den = jax.lax.rsqrt(jnp.maximum(so * st, 1e-16))           # single EUP rsqrt
    cosv = jnp.clip(num * inv_den, -1.0, 1.0)
    r_c = _acos(cosv)                                              # [T,1]

    # ---- fold the (linear) weighted combine into ONE per-row vector ---------
    # so each tile needs exactly one sublane-reduce pass.
    w = ((lamb_l2 / (b_total * n)) * r_sq
         + (lamb_l1 / (b_total * n)) * r_abs
         + (lamb_aux / (b_total * a)) * r_aux
         + (lamb_g / b_total) * r_g
         + (lamb_c / b_total) * r_c)
    w = jnp.where(valid, w, 0.0)
    acc_ref[0] += jnp.sum(w)

    @pl.when(pid == pl.num_programs(0) - 1)
    def _():
        loss_ref[0, 0] = acc_ref[0]


def _pick_tile_b(b, n, a, c, budget_bytes=8 * 1024 * 1024):
    """Rows per tile: multiple of 8, <= 512, double-buffered inputs <= budget."""
    bytes_per_row = 4 * (2 * n + 2 * a + c + 1) * 2        # 2x for double buffering
    t = min(512, max(8, budget_bytes // max(bytes_per_row, 1)))
    t = max(8, (t // 8) * 8)
    b_pad = ((b + 7) // 8) * 8
    return min(t, b_pad)


def behavior_clone_loss(output, target, aux_output, aux_target,
                        gripper_output, gripper_target,
                        lamb_l2=0.01, lamb_l1=1.0, lamb_c=0.005,
                        lamb_g=0.01, lamb_aux=0.0001):
    B, N = output.shape
    A = aux_output.shape[1]
    C = gripper_output.shape[1]

    tile_b = _pick_tile_b(B, N, A, C)
    num_tiles = pl.cdiv(B, tile_b)

    gt = gripper_target.astype(jnp.int32).reshape(B, 1)            # [B,1] int32

    kernel = functools.partial(
        _bc_loss_kernel, b_total=B, n=N, a=A, c=C, tile_b=tile_b,
        lamb_l2=float(lamb_l2), lamb_l1=float(lamb_l1), lamb_c=float(lamb_c),
        lamb_g=float(lamb_g), lamb_aux=float(lamb_aux))

    def _row_spec(width):
        return pl.BlockSpec((tile_b, width), lambda i: (i, 0))

    loss = pl.pallas_call(
        kernel,
        out_shape=jax.ShapeDtypeStruct((1, 1), jnp.float32),
        grid_spec=pltpu.PrefetchScalarGridSpec(
            num_scalar_prefetch=0,
            grid=(num_tiles,),
            in_specs=[_row_spec(N), _row_spec(N),
                      _row_spec(A), _row_spec(A),
                      _row_spec(C), _row_spec(1)],
            out_specs=pl.BlockSpec(memory_space=pltpu.MemorySpace.SMEM),
            scratch_shapes=[pltpu.SMEM((1,), jnp.float32)]),
        compiler_params=pltpu.CompilerParams(
            dimension_semantics=("arbitrary",)),
    )(output, target, aux_output, aux_target, gripper_output, gt)
    return loss[0, 0]


def reference_loss(output, target, aux_output, aux_target,
                   gripper_output, gripper_target,
                   lamb_l2=0.01, lamb_l1=1.0, lamb_c=0.005,
                   lamb_g=0.01, lamb_aux=0.0001):
    """Pure-JAX reference mirroring the PyTorch module."""
    lse = jax.nn.logsumexp(gripper_output, axis=1)
    picked = jnp.take_along_axis(gripper_output, gripper_target[:, None], axis=1)[:, 0]
    g_loss = jnp.mean(lse - picked)
    l2 = jnp.mean((output - target) ** 2)
    l1 = jnp.mean(jnp.abs(output - target))
    num = jnp.sum(output * target, axis=1)
    den = jnp.linalg.norm(target, axis=1) * jnp.linalg.norm(output, axis=1)
    cl = jnp.mean(jnp.arccos(num / den))
    aux = jnp.mean((aux_output - aux_target) ** 2)
    return lamb_l2 * l2 + lamb_l1 * l1 + lamb_c * cl + lamb_g * g_loss + lamb_aux * aux


if __name__ == "__main__":
    B, N, A, C = 8, 32, 16, 8  # batch, action dim, aux dim, gripper classes

    key = jax.random.PRNGKey(0)
    k1, k2, k3, k4, k5, k6 = jax.random.split(key, 6)
    output = jax.random.normal(k1, (B, N), dtype=jnp.float32)
    target = jax.random.normal(k2, (B, N), dtype=jnp.float32)
    aux_output = jax.random.normal(k3, (B, A), dtype=jnp.float32)
    aux_target = jax.random.normal(k4, (B, A), dtype=jnp.float32)
    gripper_output = jax.random.normal(k5, (B, C), dtype=jnp.float32)
    gripper_target = jax.random.randint(k6, (B,), 0, C, dtype=jnp.int32)

    loss = behavior_clone_loss(output, target, aux_output, aux_target,
                               gripper_output, gripper_target)
    loss = jax.block_until_ready(loss)

    ref = jax.block_until_ready(
        reference_loss(output, target, aux_output, aux_target,
                       gripper_output, gripper_target))

    assert np.isfinite(float(loss)), "kernel produced non-finite loss"
    np.testing.assert_allclose(float(loss), float(ref), rtol=1e-4, atol=1e-5)
    print("KERNEL_OK")
</pallas_src>

<mosaic_0001>
module attributes {stable_mosaic.version = 11 : i64} {
  func.func @_bc_loss_kernel(%arg0: i32, %arg1: memref<8x32xf32, #tpu.memory_space<vmem>>, %arg2: memref<8x32xf32, #tpu.memory_space<vmem>>, %arg3: memref<8x16xf32, #tpu.memory_space<vmem>>, %arg4: memref<8x16xf32, #tpu.memory_space<vmem>>, %arg5: memref<8x8xf32, #tpu.memory_space<vmem>>, %arg6: memref<8x1xi32, #tpu.memory_space<vmem>>, %arg7: memref<1x1xf32, #tpu.memory_space<smem>>, %arg8: memref<1xf32, #tpu.memory_space<smem>>) attributes {dimension_semantics = [#tpu.dimension_semantics<arbitrary>], iteration_bounds = array<i64: 1>, scalar_prefetch = 0 : i64, scratch_operands = 1 : i64, tpu.core_type = #tpu.core_type<tc>, window_params = [{transform_indices = @transform_0, window_bounds = array<i64: 8, 32>}, {transform_indices = @transform_1, window_bounds = array<i64: 8, 32>}, {transform_indices = @transform_2, window_bounds = array<i64: 8, 16>}, {transform_indices = @transform_3, window_bounds = array<i64: 8, 16>}, {transform_indices = @transform_4, window_bounds = array<i64: 8, 8>}, {transform_indices = @transform_5, window_bounds = array<i64: 8, 1>}, {transform_indices = @transform_6, window_bounds = array<i64: 1, 1>}]} {
    %c0_i32 = arith.constant 0 : i32
    %0 = arith.cmpi eq, %arg0, %c0_i32 : i32
    %1 = arith.extui %0 : i1 to i32
    %c0_i32_0 = arith.constant 0 : i32
    %2 = arith.cmpi ne, %1, %c0_i32_0 : i32
    scf.if %2 {
      %cst_48 = arith.constant 0.000000e+00 : f32
      %c0_49 = arith.constant 0 : index
      %121 = memref.load %arg8[%c0_49] : memref<1xf32, #tpu.memory_space<smem>>
      memref.store %cst_48, %arg8[%c0_49] : memref<1xf32, #tpu.memory_space<smem>>
    } else {
    }
    %c8_i32 = arith.constant 8 : i32
    %3 = arith.muli %arg0, %c8_i32 : i32
    %4 = tpu.iota {dimensions = array<i32: 0>} : vector<8x1xi32>
    %5 = vector.broadcast %3 : i32 to vector<8x1xi32>
    %6 = arith.addi %5, %4 : vector<8x1xi32>
    %c8_i32_1 = arith.constant 8 : i32
    %7 = vector.broadcast %c8_i32_1 : i32 to vector<8x1xi32>
    %8 = arith.cmpi slt, %6, %7 : vector<8x1xi32>
    %c0 = arith.constant 0 : index
    %c0_2 = arith.constant 0 : index
    %9 = vector.load %arg1[%c0, %c0_2] : memref<8x32xf32, #tpu.memory_space<vmem>>, vector<8x32xf32>
    %c0_3 = arith.constant 0 : index
    %c0_4 = arith.constant 0 : index
    %10 = vector.load %arg2[%c0_3, %c0_4] : memref<8x32xf32, #tpu.memory_space<vmem>>, vector<8x32xf32>
    %11 = arith.subf %9, %10 : vector<8x32xf32>
    %12 = arith.mulf %11, %11 : vector<8x32xf32>
    %cst = arith.constant dense<0.000000e+00> : vector<8xf32>
    %13 = vector.multi_reduction <add>, %12, %cst [1] : vector<8x32xf32> to vector<8xf32>
    %14 = vector.shape_cast %13 : vector<8xf32> to vector<8x1xf32>
    %15 = math.absf %11 : vector<8x32xf32>
    %cst_5 = arith.constant dense<0.000000e+00> : vector<8xf32>
    %16 = vector.multi_reduction <add>, %15, %cst_5 [1] : vector<8x32xf32> to vector<8xf32>
    %17 = vector.shape_cast %16 : vector<8xf32> to vector<8x1xf32>
    %c0_6 = arith.constant 0 : index
    %c0_7 = arith.constant 0 : index
    %18 = vector.load %arg3[%c0_6, %c0_7] : memref<8x16xf32, #tpu.memory_space<vmem>>, vector<8x16xf32>
    %c0_8 = arith.constant 0 : index
    %c0_9 = arith.constant 0 : index
    %19 = vector.load %arg4[%c0_8, %c0_9] : memref<8x16xf32, #tpu.memory_space<vmem>>, vector<8x16xf32>
    %20 = arith.subf %18, %19 : vector<8x16xf32>
    %21 = arith.mulf %20, %20 : vector<8x16xf32>
    %cst_10 = arith.constant dense<0.000000e+00> : vector<8xf32>
    %22 = vector.multi_reduction <add>, %21, %cst_10 [1] : vector<8x16xf32> to vector<8xf32>
    %23 = vector.shape_cast %22 : vector<8xf32> to vector<8x1xf32>
    %c0_11 = arith.constant 0 : index
    %c0_12 = arith.constant 0 : index
    %24 = vector.load %arg5[%c0_11, %c0_12] : memref<8x8xf32, #tpu.memory_space<vmem>>, vector<8x8xf32>
    %cst_13 = arith.constant dense<0xFF800000> : vector<8xf32>
    %25 = vector.multi_reduction <maximumf>, %24, %cst_13 [1] : vector<8x8xf32> to vector<8xf32>
    %26 = vector.shape_cast %25 : vector<8xf32> to vector<8x1xf32>
    %27 = vector.broadcast %26 : vector<8x1xf32> to vector<8x8xf32>
    %28 = arith.subf %24, %27 : vector<8x8xf32>
    %29 = math.exp %28 : vector<8x8xf32>
    %cst_14 = arith.constant dense<0.000000e+00> : vector<8xf32>
    %30 = vector.multi_reduction <add>, %29, %cst_14 [1] : vector<8x8xf32> to vector<8xf32>
    %31 = vector.shape_cast %30 : vector<8xf32> to vector<8x1xf32>
    %32 = math.log %31 : vector<8x1xf32>
    %33 = arith.addf %32, %26 : vector<8x1xf32>
    %34 = tpu.iota {dimensions = array<i32: 1>} : vector<8x8xi32>
    %c0_15 = arith.constant 0 : index
    %c0_16 = arith.constant 0 : index
    %35 = vector.load %arg6[%c0_15, %c0_16] : memref<8x1xi32, #tpu.memory_space<vmem>>, vector<8x1xi32>
    %36 = vector.broadcast %35 : vector<8x1xi32> to vector<8x8xi32>
    %37 = arith.cmpi eq, %34, %36 : vector<8x8xi32>
    %cst_17 = arith.constant 0.000000e+00 : f32
    %38 = vector.broadcast %cst_17 : f32 to vector<8x8xf32>
    %39 = arith.select %37, %24, %38 : vector<8x8xi1>, vector<8x8xf32>
    %cst_18 = arith.constant dense<0.000000e+00> : vector<8xf32>
    %40 = vector.multi_reduction <add>, %39, %cst_18 [1] : vector<8x8xf32> to vector<8xf32>
    %41 = vector.shape_cast %40 : vector<8xf32> to vector<8x1xf32>
    %42 = arith.subf %33, %41 : vector<8x1xf32>
    %43 = arith.mulf %9, %10 : vector<8x32xf32>
    %cst_19 = arith.constant dense<0.000000e+00> : vector<8xf32>
    %44 = vector.multi_reduction <add>, %43, %cst_19 [1] : vector<8x32xf32> to vector<8xf32>
    %45 = vector.shape_cast %44 : vector<8xf32> to vector<8x1xf32>
    %46 = arith.mulf %9, %9 : vector<8x32xf32>
    %cst_20 = arith.constant dense<0.000000e+00> : vector<8xf32>
    %47 = vector.multi_reduction <add>, %46, %cst_20 [1] : vector<8x32xf32> to vector<8xf32>
    %48 = vector.shape_cast %47 : vector<8xf32> to vector<8x1xf32>
    %49 = arith.mulf %10, %10 : vector<8x32xf32>
    %cst_21 = arith.constant dense<0.000000e+00> : vector<8xf32>
    %50 = vector.multi_reduction <add>, %49, %cst_21 [1] : vector<8x32xf32> to vector<8xf32>
    %51 = vector.shape_cast %50 : vector<8xf32> to vector<8x1xf32>
    %52 = arith.mulf %48, %51 : vector<8x1xf32>
    %cst_22 = arith.constant 1.000000e-16 : f32
    %53 = vector.broadcast %cst_22 : f32 to vector<8x1xf32>
    %54 = arith.maximumf %52, %53 : vector<8x1xf32>
    %55 = math.rsqrt %54 : vector<8x1xf32>
    %56 = arith.mulf %45, %55 : vector<8x1xf32>
    %cst_23 = arith.constant -1.000000e+00 : f32
    %cst_24 = arith.constant 1.000000e+00 : f32
    %57 = vector.broadcast %cst_23 : f32 to vector<8x1xf32>
    %58 = arith.maximumf %57, %56 : vector<8x1xf32>
    %59 = vector.broadcast %cst_24 : f32 to vector<8x1xf32>
    %60 = arith.minimumf %59, %58 : vector<8x1xf32>
    %61 = math.absf %60 : vector<8x1xf32>
    %cst_25 = arith.constant -0.0012624911 : f32
    %62 = vector.broadcast %cst_25 : f32 to vector<8x1xf32>
    %63 = arith.mulf %62, %61 : vector<8x1xf32>
    %cst_26 = arith.constant 6.670090e-03 : f32
    %64 = vector.broadcast %cst_26 : f32 to vector<8x1xf32>
    %65 = arith.addf %63, %64 : vector<8x1xf32>
    %66 = arith.mulf %65, %61 : vector<8x1xf32>
    %cst_27 = arith.constant -0.0170881264 : f32
    %67 = vector.broadcast %cst_27 : f32 to vector<8x1xf32>
    %68 = arith.addf %66, %67 : vector<8x1xf32>
    %69 = arith.mulf %68, %61 : vector<8x1xf32>
    %cst_28 = arith.constant 0.0308918804 : f32
    %70 = vector.broadcast %cst_28 : f32 to vector<8x1xf32>
    %71 = arith.addf %69, %70 : vector<8x1xf32>
    %72 = arith.mulf %71, %61 : vector<8x1xf32>
    %cst_29 = arith.constant -0.0501743034 : f32
    %73 = vector.broadcast %cst_29 : f32 to vector<8x1xf32>
    %74 = arith.addf %72, %73 : vector<8x1xf32>
    %75 = arith.mulf %74, %61 : vector<8x1xf32>
    %cst_30 = arith.constant 0.0889789909 : f32
    %76 = vector.broadcast %cst_30 : f32 to vector<8x1xf32>
    %77 = arith.addf %75, %76 : vector<8x1xf32>
    %78 = arith.mulf %77, %61 : vector<8x1xf32>
    %cst_31 = arith.constant -0.214598805 : f32
    %79 = vector.broadcast %cst_31 : f32 to vector<8x1xf32>
    %80 = arith.addf %78, %79 : vector<8x1xf32>
    %81 = arith.mulf %80, %61 : vector<8x1xf32>
    %cst_32 = arith.constant 1.57079625 : f32
    %82 = vector.broadcast %cst_32 : f32 to vector<8x1xf32>
    %83 = arith.addf %81, %82 : vector<8x1xf32>
    %cst_33 = arith.constant 1.000000e+00 : f32
    %84 = vector.broadcast %cst_33 : f32 to vector<8x1xf32>
    %85 = arith.subf %84, %61 : vector<8x1xf32>
    %cst_34 = arith.constant 0.000000e+00 : f32
    %86 = vector.broadcast %cst_34 : f32 to vector<8x1xf32>
    %87 = arith.maximumf %85, %86 : vector<8x1xf32>
    %88 = math.sqrt %87 : vector<8x1xf32>
    %89 = arith.mulf %88, %83 : vector<8x1xf32>
    %cst_35 = arith.constant 0.000000e+00 : f32
    %90 = vector.broadcast %cst_35 : f32 to vector<8x1xf32>
    %91 = arith.cmpf oge, %60, %90 : vector<8x1xf32>
    %cst_36 = arith.constant 3.14159274 : f32
    %92 = vector.broadcast %cst_36 : f32 to vector<8x1xf32>
    %93 = arith.subf %92, %89 : vector<8x1xf32>
    %94 = arith.select %91, %89, %93 : vector<8x1xi1>, vector<8x1xf32>
    %cst_37 = arith.constant 3.906250e-05 : f32
    %95 = vector.broadcast %cst_37 : f32 to vector<8x1xf32>
    %96 = arith.mulf %95, %14 : vector<8x1xf32>
    %cst_38 = arith.constant 3.906250e-03 : f32
    %97 = vector.broadcast %cst_38 : f32 to vector<8x1xf32>
    %98 = arith.mulf %97, %17 : vector<8x1xf32>
    %99 = arith.addf %96, %98 : vector<8x1xf32>
    %cst_39 = arith.constant 7.812500e-07 : f32
    %100 = vector.broadcast %cst_39 : f32 to vector<8x1xf32>
    %101 = arith.mulf %100, %23 : vector<8x1xf32>
    %102 = arith.addf %99, %101 : vector<8x1xf32>
    %cst_40 = arith.constant 1.250000e-03 : f32
    %103 = vector.broadcast %cst_40 : f32 to vector<8x1xf32>
    %104 = arith.mulf %103, %42 : vector<8x1xf32>
    %105 = arith.addf %102, %104 : vector<8x1xf32>
    %cst_41 = arith.constant 6.250000e-04 : f32
    %106 = vector.broadcast %cst_41 : f32 to vector<8x1xf32>
    %107 = arith.mulf %106, %94 : vector<8x1xf32>
    %108 = arith.addf %105, %107 : vector<8x1xf32>
    %cst_42 = arith.constant 0.000000e+00 : f32
    %109 = vector.broadcast %cst_42 : f32 to vector<8x1xf32>
    %110 = arith.select %8, %108, %109 : vector<8x1xi1>, vector<8x1xf32>
    %c0_43 = arith.constant 0 : index
    %111 = memref.load %arg8[%c0_43] : memref<1xf32, #tpu.memory_space<smem>>
    %112 = vector.shape_cast %110 : vector<8x1xf32> to vector<1x8x1xf32>
    %cst_44 = arith.constant dense<0.000000e+00> : vector<1xf32>
    %113 = vector.multi_reduction <add>, %112, %cst_44 [1, 2] : vector<1x8x1xf32> to vector<1xf32>
    %114 = vector.shape_cast %113 : vector<1xf32> to vector<1x1x1xf32>
    %115 = vector.extract %114[0, 0, 0] : f32 from vector<1x1x1xf32>
    %116 = arith.addf %111, %115 : f32
    %c0_45 = arith.constant 0 : index
    %117 = memref.load %arg8[%c0_45] : memref<1xf32, #tpu.memory_space<smem>>
    memref.store %116, %arg8[%c0_45] : memref<1xf32, #tpu.memory_space<smem>>
    %c0_i32_46 = arith.constant 0 : i32
    %118 = arith.cmpi eq, %arg0, %c0_i32_46 : i32
    %119 = arith.extui %118 : i1 to i32
    %c0_i32_47 = arith.constant 0 : i32
    %120 = arith.cmpi ne, %119, %c0_i32_47 : i32
    scf.if %120 {
      %c0_48 = arith.constant 0 : index
      %121 = memref.load %arg8[%c0_48] : memref<1xf32, #tpu.memory_space<smem>>
      %c0_49 = arith.constant 0 : index
      %c0_50 = arith.constant 0 : index
      %122 = memref.load %arg7[%c0_49, %c0_50] : memref<1x1xf32, #tpu.memory_space<smem>>
      memref.store %121, %arg7[%c0_49, %c0_50] : memref<1x1xf32, #tpu.memory_space<smem>>
    } else {
    }
    return
  }
  func.func @transform_0(%arg0: i32) -> (i32, i32) {
    %c0_i32 = arith.constant 0 : i32
    %c0_i32_0 = arith.constant 0 : i32
    return %arg0, %c0_i32 : i32, i32
  }
  func.func @transform_1(%arg0: i32) -> (i32, i32) {
    %c0_i32 = arith.constant 0 : i32
    %c0_i32_0 = arith.constant 0 : i32
    return %arg0, %c0_i32 : i32, i32
  }
  func.func @transform_2(%arg0: i32) -> (i32, i32) {
    %c0_i32 = arith.constant 0 : i32
    %c0_i32_0 = arith.constant 0 : i32
    return %arg0, %c0_i32 : i32, i32
  }
  func.func @transform_3(%arg0: i32) -> (i32, i32) {
    %c0_i32 = arith.constant 0 : i32
    %c0_i32_0 = arith.constant 0 : i32
    return %arg0, %c0_i32 : i32, i32
  }
  func.func @transform_4(%arg0: i32) -> (i32, i32) {
    %c0_i32 = arith.constant 0 : i32
    %c0_i32_0 = arith.constant 0 : i32
    return %arg0, %c0_i32 : i32, i32
  }
  func.func @transform_5(%arg0: i32) -> (i32, i32) {
    %c0_i32 = arith.constant 0 : i32
    %c0_i32_0 = arith.constant 0 : i32
    return %arg0, %c0_i32 : i32, i32
  }
  func.func @transform_6(%arg0: i32) -> (i32, i32) {
    %c0_i32 = arith.constant 0 : i32
    %c0_i32_0 = arith.constant 0 : i32
    %c0_i32_1 = arith.constant 0 : i32
    return %c0_i32, %c0_i32_0 : i32, i32
  }
}

</mosaic_0001>

<bundles_post_ra>
// kernel: tpu_custom_call.1
= control target key start
LH: loop header
LB: loop body
LE: loop exit
PB: predicated region body
PF: predicated region fallthrough
CT: control target
= control target key end

     0   :  { %11 = vsyncpa [#allocation4], 0  ;;  %s373_s0 = inlined_call_operand.vmem [shape: f32[8,32], index: 0, kind: input, shape index: {}]   ;;  %s374_s1 = inlined_call_operand.hbm [shape: f32[8,32], index: 1, kind: input, shape index: {}]   ;;  %s375_s2 = inlined_call_operand.vmem [shape: f32[8,16], index: 2, kind: input, shape index: {}]   ;;  %s376_s3 = inlined_call_operand.hbm [shape: f32[8,16], index: 3, kind: input, shape index: {}]   ;;  %s377_s4 = inlined_call_operand.vmem [shape: f32[8,8], index: 4, kind: input, shape index: {}]   ;;  %s378_s5 = inlined_call_operand.vmem [shape: s32[8,1], index: 5, kind: input, shape index: {}]   ;;  %s379_s6 = inlined_call_operand.hbm [shape: f32[1,1], index: 6, kind: output, shape index: {}]  }
   0x1   :  { %12 = vsyncpa [#allocation7], 0 }
   0x2   :  { %13 = vsyncpa [#allocation5], 0  ;;  %s274_s21 = smov [#allocation3]   ;;  %s275_s23 = smov [#allocation6]  }
   0x3   :  { %s22_s22 = sshll.u32 %s274_s21, 4  ;;  %s34_s24 = sshll.u32 %s275_s23, 4  ;;  %s23_s22 = int_to_ptr.vmem [resolvable:$true] %s22_s22  ;;  %s35_s24 = int_to_ptr.vmem [resolvable:$true] %s34_s24 }
   0x4   :  { %s214_s27 = scalar_lea.hbm %s374_s1, 128 }
   0x5   :  { %p215_p0 = scmp.ne.s32.totalorder %s374_s1, %s214_s27  ;;  %p218_p1 = scmp.lt.u32.totalorder %s214_s27, %s374_s1 }
   0x7   :  { %p220_p2 = pnand %p218_p1, %p215_p0 }
   0x9   :  { %223 = shalt.err (!%p220_p2)
}
   0xa   :  { %s224_s8 = scalar_lea.vmem %s23_s22, 128  ;;  %p229_p4 = scmp.lt.s32.totalorder %s23_s22, %s23_s22 }
   0xb   :  { %p225_p3 = scmp.ne.s32.totalorder %s23_s22, %s224_s8  ;;  %p230_p5 = scmp.lt.s32.totalorder %s224_s8, %s224_s8 }
   0xd   :  { %p231_p6 = por %p230_p5, %p229_p4 }
   0xf   :  { %p232_p7 = pnand %p231_p6, %p225_p3 }
  0x11   :  { %235 = shalt.err (!%p232_p7)
}
  0x12   :  { %25 = dma.hbm_to_vmem [thread:$0]  %s374_s1, 128, %s23_s22, [#allocation4]  }
  0x13   :  { %s236_s13 = scalar_lea.hbm %s376_s3, 128 }
  0x14   :  { %p237_p8 = scmp.ne.s32.totalorder %s376_s3, %s236_s13  ;;  %p240_p9 = scmp.lt.u32.totalorder %s236_s13, %s376_s3 }
  0x16   :  { %p242_p10 = pnand %p240_p9, %p237_p8 }
  0x18   :  { %245 = shalt.err (!%p242_p10)
}
  0x19   :  { %s246_s18 = scalar_lea.vmem %s35_s24, 128  ;;  %p251_p12 = scmp.lt.s32.totalorder %s35_s24, %s35_s24 }
  0x1a   :  { %p247_p11 = scmp.ne.s32.totalorder %s35_s24, %s246_s18  ;;  %p252_p13 = scmp.lt.s32.totalorder %s246_s18, %s246_s18 }
  0x1c   :  { %p253_p0 = por %p252_p13, %p251_p12 }
  0x1e   :  { %p254_p1 = pnand %p253_p0, %p247_p11 }
  0x20   :  { %257 = shalt.err (!%p254_p1)
}
  0x21   :  { %37 = dma.hbm_to_vmem [thread:$0]  %s376_s3, 128, %s35_s24, [#allocation7]  }
  0x22   :  { %268 = dma.done.wait [#allocation4], 128  }
  0x23   :  { %269 = vsyncadd [#allocation4], 4294967168 }
  0x24   :  { %270 = dma.done.wait [#allocation7], 128  }
  0x25   :  { %271 = vsyncadd [#allocation7], 4294967168  ;;  %v276_v0 = vmov 0   ;;  %vm81_vm0 = vcmask 64512   ;;  %v80_v1 = vld [vmem:[%s377_s4] sm:$0xff]  ;;  %vm64_vm1 = vcmask 261120   ;;  %v94_v24 = vlaneseq }
  0x26   :  { %205 = vset.pattern.permute.xlu0 %v276_v0  ;;  %v60_v2 = vld [vmem:[%s373_s0] sm:$0xff]  ;;  %v82_v3 = vsel %vm81_vm0, %v80_v1, -inf  ;;  %v73_v22 = vld [vmem:[#allocation6] sm:$0xff]  ;;  %vm76_vm2 = vcmask 130048   ;;  %vm163_vm7 = vcmask 7168   ;;  %s258_s26 = scalar_lea.hbm %s379_s6, 16 }
  0x27   :  { %v110_v4 = vmul.f32 %v60_v2, %v60_v2  ;;  %v61_v5 = vld [vmem:[#allocation3] sm:$0xff]  ;;  %83 = vmax.xlane.f32.xlu0 %v82_v3  ;;  %v95_v26 = vand.u32 127, %v94_v24  ;;  %p259_p2 = scmp.ne.s32.totalorder %s379_s6, %s258_s26  ;;  %p262_p3 = scmp.lt.u32.totalorder %s258_s26, %s379_s6 }
  0x28   :  { %v114_v6 = vmul.f32 %v61_v5, %v61_v5  ;;  %v106_v9 = vmul.f32 %v61_v5, %v60_v2  ;;  %v96_v11 = vld [vmem:[%s378_s5] sm:$0xff]  ;;  %v62_v12 = vsub.f32 %v60_v2, %v61_v5 }
  0x29   :  { %v111_v7 = vsel %vm64_vm1, %v110_v4, 0.0  ;;  %v72_v21 = vld [vmem:[%s375_s2] sm:$0xff]  ;;  %p264_p4 = pnand %p262_p3, %p259_p2 }
  0x2a   :  { %112 = vadd.xlane.f32.xlu1 %v111_v7  ;;  %v115_v8 = vsel %vm64_vm1, %v114_v6, 0.0  ;;  %v107_v10 = vsel %vm64_vm1, %v106_v9, 0.0  ;;  %v63_v13 = vmul.f32 %v62_v12, %v62_v12  ;;  %v68_v15 = vand.u32 2147483647, %v62_v12 }
  0x2b   :  { %v74_v25 = vsub.f32 %v72_v21, %v73_v22 }
  0x2c   :  { %v65_v14 = vsel %vm64_vm1, %v63_v13, 0.0  ;;  %v69_v16 = vsel %vm64_vm1, %v68_v15, 0.0 }
  0x2d   :  { %v75_v28 = vmul.f32 %v74_v25, %v74_v25 }
  0x2e   :  { %116 = vadd.xlane.f32.xlu1 %v115_v8 }
  0x2f   :  { %v77_v29 = vsel %vm76_vm2, %v75_v28, 0.0 }
  0x32   :  { %108 = vadd.xlane.f32.xlu1 %v107_v10 }
  0x3d   :  { %98 = vperm.xlu0 %205, %v96_v11  }
  0xb4   :  { %v352_v17 = vpop.xlane.xlu0 %83 }
  0xb5   :  { %v85_v18 = vsub.f32 %v80_v1, %v352_v17 }
  0xb7   :  { %v86_v19 = vmul.f32 1.442695, %v85_v18  ;;  %v113_v32 = vpop.xlane.xlu1 %112 }
  0xb9   :  { %206 = vpow2.f32 %v86_v19 }
  0xbb   :  { %v117_v33 = vpop.xlane.xlu1 %116 }
  0xbc   :  { %v99_v27 = vpop.permute.xlu0 %98  ;;  %v118_v34 = vmul.f32 %v117_v33, %v113_v32 }
  0xbd   :  { %vm100_vm3 = vcmp.eq.s32.totalorder %v95_v26, %v99_v27 }
  0xbe   :  { %v101_v30 = vsel %vm100_vm3, %v80_v1, 0.0  ;;  %v119_v35 = vmax.f32 %v118_v34, 1e-16 }
  0xbf   :  { %v102_v31 = vsel %vm81_vm0, %v101_v30, 0.0  ;;  %v109_v37 = vpop.xlane.xlu1 %108 }
  0xc0   :  { %208 = vrsqrt.f32 %v119_v35 }
  0xc3   :  { %v207_v20 = vpop.eup %206 }
  0xc4   :  { %v88_v23 = vsel %vm81_vm0, %v207_v20, 0.0 }
  0xc5   :  { %89 = vadd.xlane.f32.xlu1 %v88_v23 }
  0xc9   :  { %66 = vadd.xlane.f32.xlu1 %v65_v14 }
  0xca   :  { %v209_v36 = vpop.eup %208 }
  0xcb   :  { %v121_v38 = vmul.f32 %v209_v36, %v109_v37 }
  0xcd   :  { %70 = vadd.xlane.f32.xlu1 %v69_v16  ;;  %v198_v39 = vclamps-f32 %v121_v38, 1.0 }
  0xcf   :  { %v124_v40 = vand.u32 2147483647, %v198_v39  ;;  %vm149_vm6 = vcmp.ge.f32.partialorder %v198_v39, 0.0 }
  0xd1   :  { %78 = vadd.xlane.f32.xlu1 %v77_v29  ;;  %v125_v41 = vmul.f32 -0.0012624911, %v124_v40  ;;  %v139_v48 = vsub.f32 1.0, %v124_v40 }
  0xd3   :  { %v126_v42 = vadd.f32 0.00667009, %v125_v41  ;;  %v140_v50 = vmax.f32 %v139_v48, 0.0 }
  0xd5   :  { %103 = vadd.xlane.f32.xlu1 %v102_v31  ;;  %v127_v43 = vmul.f32 %v126_v42, %v124_v40  ;;  %210 = vrsqrt.f32 %v140_v50  ;;  %vm143_vm4 = vcmp.eq.f32.partialorder %v140_v50, inf  ;;  %v146_v59 = vand.u32 2147483648, %v140_v50 }
  0xd6   :  { %vm145_vm5 = vcmp.eq.f32.partialorder %v140_v50, 0.0 }
  0xd7   :  { %v128_v44 = vadd.f32 -0.017088126, %v127_v43 }
  0xd9   :  { %v129_v45 = vmul.f32 %v128_v44, %v124_v40 }
  0xdb   :  { %v130_v46 = vadd.f32 0.03089188, %v129_v45 }
  0xdd   :  { %v131_v47 = vmul.f32 %v130_v46, %v124_v40 }
  0xdf   :  { %v132_v49 = vadd.f32 -0.050174303, %v131_v47  ;;  %v211_v54 = vpop.eup %210 }
  0xe0   :  { %v142_v57 = vmul.f32 %v211_v54, %v140_v50 }
  0xe1   :  { %v133_v51 = vmul.f32 %v132_v49, %v124_v40 }
  0xe2   :  { %v144_v61 = vsel %vm143_vm4, %v140_v50, %v142_v57 }
  0xe3   :  { %v134_v52 = vadd.f32 0.08897899, %v133_v51  ;;  %v147_v63 = vsel %vm145_vm5, %v146_v59, %v144_v61 }
  0xe5   :  { %v135_v53 = vmul.f32 %v134_v52, %v124_v40 }
  0xe7   :  { %v136_v55 = vadd.f32 -0.2145988, %v135_v53 }
  0xe9   :  { %v137_v58 = vmul.f32 %v136_v55, %v124_v40 }
  0xeb   :  { %v138_v62 = vadd.f32 1.5707963, %v137_v58 }
  0xed   :  { %v148_v1 = vmul.f32 %v147_v63, %v138_v62 }
  0xef   :  { %v150_v7 = vsub.f32 3.1415927, %v148_v1 }
  0xf1   :  { %v151_v13 = vsel %vm149_vm6, %v148_v1, %v150_v7 }
  0xf2   :  { %v159_v18 = vmul.f32 0.000625, %v151_v13 }
 0x152   :  { %v90_v56 = vpop.xlane.xlu1 %89 }
 0x153   :  { %212 = vlog2.f32 %v90_v56 }
 0x156   :  { %v67_v60 = vpop.xlane.xlu1 %66 }
 0x157   :  { %v152_v8 = vmul.f32 3.90625e-05, %v67_v60 }
 0x15a   :  { %v71_v0 = vpop.xlane.xlu1 %70 }
 0x15b   :  { %v153_v5 = vmul.f32 0.00390625, %v71_v0 }
 0x15d   :  { %v213_v2 = vpop.eup %212  ;;  %v154_v11 = vadd.f32 %v153_v5, %v152_v8 }
 0x15e   :  { %v92_v3 = vmul.f32 0.6931472, %v213_v2  ;;  %v79_v4 = vpop.xlane.xlu1 %78 }
 0x15f   :  { %v155_v9 = vmul.f32 7.8125e-07, %v79_v4 }
 0x160   :  { %v93_v6 = vadd.f32 %v92_v3, %v352_v17 }
 0x161   :  { %v156_v14 = vadd.f32 %v155_v9, %v154_v11 }
 0x162   :  { %v104_v10 = vpop.xlane.xlu1 %103 }
 0x163   :  { %v105_v12 = vsub.f32 %v93_v6, %v104_v10 }
 0x165   :  { %v157_v15 = vmul.f32 0.00125, %v105_v12 }
 0x167   :  { %v158_v16 = vadd.f32 %v157_v15, %v156_v14 }
 0x169   :  { %v160_v19 = vadd.f32 %v159_v18, %v158_v16 }
 0x16b   :  { %v164_v20 = vsel %vm163_vm7, %v160_v19, 0.0 }
 0x16c   :  { %165 = vadd.xlane.f32.xlu1 %v164_v20 }
 0x1f9   :  { %v166_v21 = vpop.xlane.xlu1 %165 }
 0x1fa   :  { %v167_v22 = vrot.slane %v166_v21, 4 }
 0x1fc   :  { %v168_v23 = vadd.f32 %v167_v22, %v166_v21 }
 0x1fe   :  { %v169_v17 = vrot.slane %v168_v23, 2 }
 0x200   :  { %v170_v24 = vadd.f32 %v169_v17, %v168_v23 }
 0x202   :  { %v171_v25 = vrot.slane %v170_v24, 1 }
 0x204   :  { %v172_v26 = vadd.f32 %v171_v25, %v170_v24 }
 0x206   :  { %199 = vpush %v172_v26 }
 0x237   :  { %s200_s2 = spop %199 }
 0x238   :  { %182 = sst [smem:[#allocation8]] %s200_s2 }
 0x239   :  { %267 = shalt.err (!%p264_p4)
}
 0x23a   :  { %s277_s7 = smov [#allocation8]  }
 0x23b   :  { %190 = dma.smem_to_hbm %s277_s7, 16, %s379_s6, [#allocation5]  }
 0x23c   :  { %272 = dma.done.wait [#allocation5], 16  }
 0x23d   :  { %273 = vsyncadd [#allocation5], 4294967280 }
 0x23e   :  { %194 = sfence }
 0x23f   :  { %195 = vsyncpa [#allocation4], 1 }
 0x240   :  { %196 = vsyncpa [#allocation7], 1 }
 0x241   :  { %197 = vsyncpa [#allocation5], 1 }

</bundles_post_ra>
